<compile_context>
chip_gen: v6e
topology: v6e:2x2x1
jax: 0.10.0
libtpu: 0.0.40
codegen_flags: <defaults>
</compile_context>

<pallas_src>
import functools

import jax
import jax.numpy as jnp
from jax import lax
from jax.experimental import pallas as pl
from jax.experimental.pallas import tpu as pltpu


_RC = 8  # inner row-chunk (one sublane group); bounds the live vreg working set


def _final_step_kernel(w_ref, b_ref, xc_ref, xp_ref, o_ref, *, H, W, num_out, c_in):
    """One (batch, row-block) grid step of conv1x1(padding=1) + sigmoid.

    w_ref : SMEM (num, C_in)      1x1 conv weight (squeezed)
    b_ref : SMEM (num,)           conv bias
    xc_ref: VMEM (C_in, R, W128)  input rows [j*R, j*R + R)   (OOB rows/lanes: garbage, masked)
    xp_ref: VMEM (C_in, 8, W128)  input rows [j*R - 8, j*R); local row 7 == input row j*R - 1
    o_ref : VMEM (num, R, W128)   padded-output rows [j*R, j*R + R), cols [0, W128)
    """
    R = xc_ref.shape[1]
    W128 = o_ref.shape[-1]
    row0 = pl.program_id(1) * R  # first padded-output row of this block

    loc_rows = lax.broadcasted_iota(jnp.int32, (_RC, W128), 0)
    cols = lax.broadcasted_iota(jnp.int32, (_RC, W128), 1)
    col_interior = (cols >= 1) & (cols <= W)

    def conv(xs):
        # Tiny C_in -> num contraction as scalar-weight FMAs on the VPU.
        outs = []
        for o in range(num_out):
            acc = xs[0] * w_ref[o, 0] + b_ref[o]
            for c in range(1, c_in):
                acc = acc + xs[c] * w_ref[o, c]
            outs.append(acc)
        return outs

    # Pre-sigmoid conv of the input row just above this block; only consumed
    # when the first padded row of the block is an interior row.
    prev0 = tuple(conv([xp_ref[c, pl.ds(_RC - 1, 1), :] for c in range(c_in)]))

    def chunk(t, prev):
        r_off = pl.multiple_of(t * _RC, _RC)
        xs = [xc_ref[c, pl.ds(r_off, _RC), :] for c in range(c_in)]
        cur = conv(xs)                                    # num x (_RC, W128)
        grow = row0 + r_off + loc_rows                    # global padded-row ids
        interior = (grow >= 1) & (grow <= H) & col_interior
        nxt = []
        for o in range(num_out):
            # Padded pixel (r, k) takes the conv of input pixel (r-1, k-1):
            # shift rows down by one (row 0 from the carried previous row),
            # then shift cols right by one. Rolls run on the XLU.
            sh = pltpu.roll(cur[o], shift=1, axis=0)
            sh = jnp.where(loc_rows == 0, prev[o], sh)
            sh = pltpu.roll(sh, shift=1, axis=1)
            # Border pixels of a 1x1 conv with padding=1 see only zeros -> bias.
            vals = jax.nn.sigmoid(jnp.where(interior, sh, b_ref[o]))
            o_ref[o, pl.ds(r_off, _RC), :] = vals
            nxt.append(lax.slice_in_dim(cur[o], _RC - 1, _RC, axis=0))
        return tuple(nxt)

    lax.fori_loop(0, R // _RC, chunk, prev0)


def _round_up(x, m):
    return ((x + m - 1) // m) * m


def _pick_row_block(N, C_in, num, H, W, Hp, W128):
    """Rows per grid step: ~MBs of raw HBM bytes per step, conservative VMEM
    footprint (safe on v5e/v6e/v7x), and >=2 grid steps for megacore."""
    hbm_bytes_per_row = 4 * (C_in * W + num * (W + 2))
    r = (3 << 20) // max(hbm_bytes_per_row, 1)            # ~3 MB of HBM traffic / step
    vmem_bytes_per_row = 2 * 4 * (C_in + num) * W128      # double-buffered in+out blocks
    r = min(r, (10 << 20) // max(vmem_bytes_per_row, 1))  # ~10 MiB live VMEM budget
    r = min(r, _round_up(Hp, _RC))                        # never taller than the padded image
    r = max(_RC, (r // _RC) * _RC)
    while N * pl.cdiv(Hp, r) < 2 and r > _RC:             # keep both v7x TensorCores busy
        r = max(_RC, ((r // 2) // _RC) * _RC)
    return int(r)


def final_step_pallas(x_nchw, weight, bias, *, row_block=None):
    """Conv2d(in_channels -> num, kernel_size=1, stride=1, padding=1) + Sigmoid.

    x_nchw: [N, C_in, H, W] float32
    weight: [num, C_in] (or [num, C_in, 1, 1])
    bias:   [num]
    returns [N, num, H+2, W+2] float32, written directly by the kernel.
    """
    N, C_in, H, W = x_nchw.shape
    num = weight.shape[0]
    Hp, Wp = H + 2, W + 2
    W128 = _round_up(Wp, 128)  # lane extent of every block (>= padded width)

    x = x_nchw.astype(jnp.float32)
    w = weight.reshape(num, C_in).astype(jnp.float32)
    b = bias.reshape(num).astype(jnp.float32)

    R = row_block if row_block is not None else _pick_row_block(N, C_in, num, H, W, Hp, W128)
    assert R % _RC == 0 and R >= _RC
    n_row_blocks = pl.cdiv(Hp, R)

    # Clamp edge-block indices so no fully out-of-bounds input DMA is issued
    # (whenever the clamp changes an index, the fetched rows are provably unused).
    jmax_cur = max(pl.cdiv(H, R) - 1, 0)
    jmax_prev = max(pl.cdiv(H, _RC) - 1, 0)
    r_per_chunk = R // _RC

    kernel = functools.partial(_final_step_kernel, H=H, W=W, num_out=num, c_in=C_in)

    block_bytes = 2 * 4 * W128 * ((C_in + num) * R + C_in * _RC)
    vmem_limit = int(min(48 << 20, max(32 << 20, 4 * block_bytes)))

    out = pl.pallas_call(
        kernel,
        out_shape=jax.ShapeDtypeStruct((N, num, Hp, Wp), jnp.float32),
        grid=(N, n_row_blocks),
        in_specs=[
            pl.BlockSpec(memory_space=pltpu.MemorySpace.SMEM),   # weight
            pl.BlockSpec(memory_space=pltpu.MemorySpace.SMEM),   # bias
            # current input row block
            pl.BlockSpec((None, C_in, R, W128),
                         lambda n, j: (n, 0, jnp.minimum(j, jmax_cur), 0)),
            # the 8 input rows just above this block (local row 7 == row j*R - 1)
            pl.BlockSpec((None, C_in, _RC, W128),
                         lambda n, j: (n, 0, jnp.clip(j * r_per_chunk - 1, 0, jmax_prev), 0)),
        ],
        out_specs=pl.BlockSpec((None, num, R, W128), lambda n, j: (n, 0, j, 0)),
        compiler_params=pltpu.CompilerParams(
            dimension_semantics=("parallel", "parallel"),
            vmem_limit_bytes=vmem_limit,
        ),
        cost_estimate=pl.CostEstimate(
            flops=2 * N * H * W * C_in * num,
            transcendentals=N * Hp * Wp * num,
            bytes_accessed=4 * (N * C_in * H * W + N * num * Hp * Wp),
        ),
    )(w, b, x, x)
    return out


def _reference(x, weight, bias):
    # Pure-JAX reference for sanity checking.
    x_pad = jnp.pad(x, ((0, 0), (0, 0), (1, 1), (1, 1)))
    w = weight.reshape(weight.shape[0], x.shape[1])
    y = jnp.einsum("nchw,oc->nohw", x_pad, w) + bias[None, :, None, None]
    return jax.nn.sigmoid(y)


if __name__ == "__main__":
    key = jax.random.PRNGKey(0)
    kx, kw, kb = jax.random.split(key, 3)

    N, C_in, H, W = 2, 4, 16, 16
    num = 3
    bound = 1.0 / (C_in ** 0.5)
    weight = jax.random.uniform(kw, (num, C_in), minval=-bound, maxval=bound,
                                dtype=jnp.float32)
    bias = jax.random.uniform(kb, (num,), minval=-bound, maxval=bound,
                              dtype=jnp.float32)
    x = jax.random.normal(kx, (N, C_in, H, W), dtype=jnp.float32)

    out = jax.block_until_ready(final_step_pallas(x, weight, bias))
    ref = _reference(x, weight, bias)
    assert out.shape == (N, num, H + 2, W + 2), out.shape
    assert jnp.allclose(out, ref, atol=1e-5, rtol=1e-5), "mismatch (auto row block)"

    # Exercise the multi-row-block path (j >= 1 consumes the 'previous row' spec).
    out_rb8 = jax.block_until_ready(final_step_pallas(x, weight, bias, row_block=8))
    assert jnp.allclose(out_rb8, ref, atol=1e-5, rtol=1e-5), "mismatch (row_block=8)"

    # Non-multiple-of-8 spatial size exercises partial edge blocks.
    x2 = jax.random.normal(jax.random.PRNGKey(1), (1, C_in, 20, 20), dtype=jnp.float32)
    out2 = jax.block_until_ready(final_step_pallas(x2, weight, bias, row_block=8))
    assert jnp.allclose(out2, _reference(x2, weight, bias), atol=1e-5, rtol=1e-5), \
        "mismatch (20x20)"

    print("KERNEL_OK")
</pallas_src>

<mosaic_0001>
module attributes {stable_mosaic.version = 11 : i64} {
  func.func @_final_step_kernel(%arg0: i32, %arg1: i32, %arg2: memref<3x4xf32, #tpu.memory_space<smem>>, %arg3: memref<3xf32, #tpu.memory_space<smem>>, %arg4: memref<1x4x24x128xf32, #tpu.memory_space<vmem>>, %arg5: memref<1x4x8x128xf32, #tpu.memory_space<vmem>>, %arg6: memref<1x3x24x128xf32, #tpu.memory_space<vmem>>) attributes {dimension_semantics = [#tpu.dimension_semantics<parallel>, #tpu.dimension_semantics<parallel>], iteration_bounds = array<i64: 2, 1>, scalar_prefetch = 0 : i64, scratch_operands = 0 : i64, tpu.core_type = #tpu.core_type<tc>, window_params = [{transform_indices = @transform_0, window_bounds = array<i64: 3, 4>}, {transform_indices = @transform_1, window_bounds = array<i64: 3>}, {transform_indices = @transform_2, window_bounds = array<i64: 1, 4, 24, 128>}, {transform_indices = @transform_3, window_bounds = array<i64: 1, 4, 8, 128>}, {transform_indices = @transform_4, window_bounds = array<i64: 1, 3, 24, 128>}]} {
    %c24_i32 = arith.constant 24 : i32
    %0 = arith.muli %arg1, %c24_i32 : i32
    %1 = tpu.iota {dimensions = array<i32: 0>} : vector<8x128xi32>
    %2 = tpu.iota {dimensions = array<i32: 1>} : vector<8x128xi32>
    %c1_i32 = arith.constant 1 : i32
    %3 = vector.broadcast %c1_i32 : i32 to vector<8x128xi32>
    %4 = arith.cmpi sge, %2, %3 : vector<8x128xi32>
    %c16_i32 = arith.constant 16 : i32
    %5 = vector.broadcast %c16_i32 : i32 to vector<8x128xi32>
    %6 = arith.cmpi sle, %2, %5 : vector<8x128xi32>
    %7 = arith.andi %4, %6 : vector<8x128xi1>
    %c0 = arith.constant 0 : index
    %c0_0 = arith.constant 0 : index
    %c7 = arith.constant 7 : index
    %c0_1 = arith.constant 0 : index
    %8 = vector.load %arg5[%c0, %c0_0, %c7, %c0_1] : memref<1x4x8x128xf32, #tpu.memory_space<vmem>>, vector<1x1x1x128xf32>
    %9 = vector.shape_cast %8 : vector<1x1x1x128xf32> to vector<1x128xf32>
    %c0_2 = arith.constant 0 : index
    %c1 = arith.constant 1 : index
    %c7_3 = arith.constant 7 : index
    %c0_4 = arith.constant 0 : index
    %10 = vector.load %arg5[%c0_2, %c1, %c7_3, %c0_4] : memref<1x4x8x128xf32, #tpu.memory_space<vmem>>, vector<1x1x1x128xf32>
    %11 = vector.shape_cast %10 : vector<1x1x1x128xf32> to vector<1x128xf32>
    %c0_5 = arith.constant 0 : index
    %c2 = arith.constant 2 : index
    %c7_6 = arith.constant 7 : index
    %c0_7 = arith.constant 0 : index
    %12 = vector.load %arg5[%c0_5, %c2, %c7_6, %c0_7] : memref<1x4x8x128xf32, #tpu.memory_space<vmem>>, vector<1x1x1x128xf32>
    %13 = vector.shape_cast %12 : vector<1x1x1x128xf32> to vector<1x128xf32>
    %c0_8 = arith.constant 0 : index
    %c3 = arith.constant 3 : index
    %c7_9 = arith.constant 7 : index
    %c0_10 = arith.constant 0 : index
    %14 = vector.load %arg5[%c0_8, %c3, %c7_9, %c0_10] : memref<1x4x8x128xf32, #tpu.memory_space<vmem>>, vector<1x1x1x128xf32>
    %15 = vector.shape_cast %14 : vector<1x1x1x128xf32> to vector<1x128xf32>
    %c0_11 = arith.constant 0 : index
    %c0_12 = arith.constant 0 : index
    %16 = memref.load %arg2[%c0_11, %c0_12] : memref<3x4xf32, #tpu.memory_space<smem>>
    %17 = vector.broadcast %16 : f32 to vector<1x128xf32>
    %18 = arith.mulf %9, %17 : vector<1x128xf32>
    %c0_13 = arith.constant 0 : index
    %19 = memref.load %arg3[%c0_13] : memref<3xf32, #tpu.memory_space<smem>>
    %20 = vector.broadcast %19 : f32 to vector<1x128xf32>
    %21 = arith.addf %18, %20 : vector<1x128xf32>
    %c0_14 = arith.constant 0 : index
    %c1_15 = arith.constant 1 : index
    %22 = memref.load %arg2[%c0_14, %c1_15] : memref<3x4xf32, #tpu.memory_space<smem>>
    %23 = vector.broadcast %22 : f32 to vector<1x128xf32>
    %24 = arith.mulf %11, %23 : vector<1x128xf32>
    %25 = arith.addf %21, %24 : vector<1x128xf32>
    %c0_16 = arith.constant 0 : index
    %c2_17 = arith.constant 2 : index
    %26 = memref.load %arg2[%c0_16, %c2_17] : memref<3x4xf32, #tpu.memory_space<smem>>
    %27 = vector.broadcast %26 : f32 to vector<1x128xf32>
    %28 = arith.mulf %13, %27 : vector<1x128xf32>
    %29 = arith.addf %25, %28 : vector<1x128xf32>
    %c0_18 = arith.constant 0 : index
    %c3_19 = arith.constant 3 : index
    %30 = memref.load %arg2[%c0_18, %c3_19] : memref<3x4xf32, #tpu.memory_space<smem>>
    %31 = vector.broadcast %30 : f32 to vector<1x128xf32>
    %32 = arith.mulf %15, %31 : vector<1x128xf32>
    %33 = arith.addf %29, %32 : vector<1x128xf32>
    %c1_20 = arith.constant 1 : index
    %c0_21 = arith.constant 0 : index
    %34 = memref.load %arg2[%c1_20, %c0_21] : memref<3x4xf32, #tpu.memory_space<smem>>
    %35 = vector.broadcast %34 : f32 to vector<1x128xf32>
    %36 = arith.mulf %9, %35 : vector<1x128xf32>
    %c1_22 = arith.constant 1 : index
    %37 = memref.load %arg3[%c1_22] : memref<3xf32, #tpu.memory_space<smem>>
    %38 = vector.broadcast %37 : f32 to vector<1x128xf32>
    %39 = arith.addf %36, %38 : vector<1x128xf32>
    %c1_23 = arith.constant 1 : index
    %c1_24 = arith.constant 1 : index
    %40 = memref.load %arg2[%c1_23, %c1_24] : memref<3x4xf32, #tpu.memory_space<smem>>
    %41 = vector.broadcast %40 : f32 to vector<1x128xf32>
    %42 = arith.mulf %11, %41 : vector<1x128xf32>
    %43 = arith.addf %39, %42 : vector<1x128xf32>
    %c1_25 = arith.constant 1 : index
    %c2_26 = arith.constant 2 : index
    %44 = memref.load %arg2[%c1_25, %c2_26] : memref<3x4xf32, #tpu.memory_space<smem>>
    %45 = vector.broadcast %44 : f32 to vector<1x128xf32>
    %46 = arith.mulf %13, %45 : vector<1x128xf32>
    %47 = arith.addf %43, %46 : vector<1x128xf32>
    %c1_27 = arith.constant 1 : index
    %c3_28 = arith.constant 3 : index
    %48 = memref.load %arg2[%c1_27, %c3_28] : memref<3x4xf32, #tpu.memory_space<smem>>
    %49 = vector.broadcast %48 : f32 to vector<1x128xf32>
    %50 = arith.mulf %15, %49 : vector<1x128xf32>
    %51 = arith.addf %47, %50 : vector<1x128xf32>
    %c2_29 = arith.constant 2 : index
    %c0_30 = arith.constant 0 : index
    %52 = memref.load %arg2[%c2_29, %c0_30] : memref<3x4xf32, #tpu.memory_space<smem>>
    %53 = vector.broadcast %52 : f32 to vector<1x128xf32>
    %54 = arith.mulf %9, %53 : vector<1x128xf32>
    %c2_31 = arith.constant 2 : index
    %55 = memref.load %arg3[%c2_31] : memref<3xf32, #tpu.memory_space<smem>>
    %56 = vector.broadcast %55 : f32 to vector<1x128xf32>
    %57 = arith.addf %54, %56 : vector<1x128xf32>
    %c2_32 = arith.constant 2 : index
    %c1_33 = arith.constant 1 : index
    %58 = memref.load %arg2[%c2_32, %c1_33] : memref<3x4xf32, #tpu.memory_space<smem>>
    %59 = vector.broadcast %58 : f32 to vector<1x128xf32>
    %60 = arith.mulf %11, %59 : vector<1x128xf32>
    %61 = arith.addf %57, %60 : vector<1x128xf32>
    %c2_34 = arith.constant 2 : index
    %c2_35 = arith.constant 2 : index
    %62 = memref.load %arg2[%c2_34, %c2_35] : memref<3x4xf32, #tpu.memory_space<smem>>
    %63 = vector.broadcast %62 : f32 to vector<1x128xf32>
    %64 = arith.mulf %13, %63 : vector<1x128xf32>
    %65 = arith.addf %61, %64 : vector<1x128xf32>
    %c2_36 = arith.constant 2 : index
    %c3_37 = arith.constant 3 : index
    %66 = memref.load %arg2[%c2_36, %c3_37] : memref<3x4xf32, #tpu.memory_space<smem>>
    %67 = vector.broadcast %66 : f32 to vector<1x128xf32>
    %68 = arith.mulf %15, %67 : vector<1x128xf32>
    %69 = arith.addf %65, %68 : vector<1x128xf32>
    %c0_i32 = arith.constant 0 : i32
    %c3_i32 = arith.constant 3 : i32
    %70 = arith.addi %c0_i32, %c3_i32 : i32
    %c1_i32_38 = arith.constant 1 : i32
    %71:3 = scf.for %arg7 = %c0_i32 to %70 step %c1_i32_38 iter_args(%arg8 = %33, %arg9 = %51, %arg10 = %69) -> (vector<1x128xf32>, vector<1x128xf32>, vector<1x128xf32>)  : i32 {
      %c8_i32 = arith.constant 8 : i32
      %72 = arith.muli %arg7, %c8_i32 : i32
      %73 = tpu.assume_multiple %72, 8 : i32
      %c0_40 = arith.constant 0 : index
      %c0_41 = arith.constant 0 : index
      %74 = arith.index_cast %73 : i32 to index
      %c0_42 = arith.constant 0 : index
      %75 = vector.load %arg4[%c0_40, %c0_41, %74, %c0_42] : memref<1x4x24x128xf32, #tpu.memory_space<vmem>>, vector<1x1x8x128xf32>
      %76 = vector.shape_cast %75 : vector<1x1x8x128xf32> to vector<8x128xf32>
      %c0_43 = arith.constant 0 : index
      %c1_44 = arith.constant 1 : index
      %77 = arith.index_cast %73 : i32 to index
      %c0_45 = arith.constant 0 : index
      %78 = vector.load %arg4[%c0_43, %c1_44, %77, %c0_45] : memref<1x4x24x128xf32, #tpu.memory_space<vmem>>, vector<1x1x8x128xf32>
      %79 = vector.shape_cast %78 : vector<1x1x8x128xf32> to vector<8x128xf32>
      %c0_46 = arith.constant 0 : index
      %c2_47 = arith.constant 2 : index
      %80 = arith.index_cast %73 : i32 to index
      %c0_48 = arith.constant 0 : index
      %81 = vector.load %arg4[%c0_46, %c2_47, %80, %c0_48] : memref<1x4x24x128xf32, #tpu.memory_space<vmem>>, vector<1x1x8x128xf32>
      %82 = vector.shape_cast %81 : vector<1x1x8x128xf32> to vector<8x128xf32>
      %c0_49 = arith.constant 0 : index
      %c3_50 = arith.constant 3 : index
      %83 = arith.index_cast %73 : i32 to index
      %c0_51 = arith.constant 0 : index
      %84 = vector.load %arg4[%c0_49, %c3_50, %83, %c0_51] : memref<1x4x24x128xf32, #tpu.memory_space<vmem>>, vector<1x1x8x128xf32>
      %85 = vector.shape_cast %84 : vector<1x1x8x128xf32> to vector<8x128xf32>
      %c0_52 = arith.constant 0 : index
      %c0_53 = arith.constant 0 : index
      %86 = memref.load %arg2[%c0_52, %c0_53] : memref<3x4xf32, #tpu.memory_space<smem>>
      %87 = vector.broadcast %86 : f32 to vector<8x128xf32>
      %88 = arith.mulf %76, %87 : vector<8x128xf32>
      %c0_54 = arith.constant 0 : index
      %89 = memref.load %arg3[%c0_54] : memref<3xf32, #tpu.memory_space<smem>>
      %90 = vector.broadcast %89 : f32 to vector<8x128xf32>
      %91 = arith.addf %88, %90 : vector<8x128xf32>
      %c0_55 = arith.constant 0 : index
      %c1_56 = arith.constant 1 : index
      %92 = memref.load %arg2[%c0_55, %c1_56] : memref<3x4xf32, #tpu.memory_space<smem>>
      %93 = vector.broadcast %92 : f32 to vector<8x128xf32>
      %94 = arith.mulf %79, %93 : vector<8x128xf32>
      %95 = arith.addf %91, %94 : vector<8x128xf32>
      %c0_57 = arith.constant 0 : index
      %c2_58 = arith.constant 2 : index
      %96 = memref.load %arg2[%c0_57, %c2_58] : memref<3x4xf32, #tpu.memory_space<smem>>
      %97 = vector.broadcast %96 : f32 to vector<8x128xf32>
      %98 = arith.mulf %82, %97 : vector<8x128xf32>
      %99 = arith.addf %95, %98 : vector<8x128xf32>
      %c0_59 = arith.constant 0 : index
      %c3_60 = arith.constant 3 : index
      %100 = memref.load %arg2[%c0_59, %c3_60] : memref<3x4xf32, #tpu.memory_space<smem>>
      %101 = vector.broadcast %100 : f32 to vector<8x128xf32>
      %102 = arith.mulf %85, %101 : vector<8x128xf32>
      %103 = arith.addf %99, %102 : vector<8x128xf32>
      %c1_61 = arith.constant 1 : index
      %c0_62 = arith.constant 0 : index
      %104 = memref.load %arg2[%c1_61, %c0_62] : memref<3x4xf32, #tpu.memory_space<smem>>
      %105 = vector.broadcast %104 : f32 to vector<8x128xf32>
      %106 = arith.mulf %76, %105 : vector<8x128xf32>
      %c1_63 = arith.constant 1 : index
      %107 = memref.load %arg3[%c1_63] : memref<3xf32, #tpu.memory_space<smem>>
      %108 = vector.broadcast %107 : f32 to vector<8x128xf32>
      %109 = arith.addf %106, %108 : vector<8x128xf32>
      %c1_64 = arith.constant 1 : index
      %c1_65 = arith.constant 1 : index
      %110 = memref.load %arg2[%c1_64, %c1_65] : memref<3x4xf32, #tpu.memory_space<smem>>
      %111 = vector.broadcast %110 : f32 to vector<8x128xf32>
      %112 = arith.mulf %79, %111 : vector<8x128xf32>
      %113 = arith.addf %109, %112 : vector<8x128xf32>
      %c1_66 = arith.constant 1 : index
      %c2_67 = arith.constant 2 : index
      %114 = memref.load %arg2[%c1_66, %c2_67] : memref<3x4xf32, #tpu.memory_space<smem>>
      %115 = vector.broadcast %114 : f32 to vector<8x128xf32>
      %116 = arith.mulf %82, %115 : vector<8x128xf32>
      %117 = arith.addf %113, %116 : vector<8x128xf32>
      %c1_68 = arith.constant 1 : index
      %c3_69 = arith.constant 3 : index
      %118 = memref.load %arg2[%c1_68, %c3_69] : memref<3x4xf32, #tpu.memory_space<smem>>
      %119 = vector.broadcast %118 : f32 to vector<8x128xf32>
      %120 = arith.mulf %85, %119 : vector<8x128xf32>
      %121 = arith.addf %117, %120 : vector<8x128xf32>
      %c2_70 = arith.constant 2 : index
      %c0_71 = arith.constant 0 : index
      %122 = memref.load %arg2[%c2_70, %c0_71] : memref<3x4xf32, #tpu.memory_space<smem>>
      %123 = vector.broadcast %122 : f32 to vector<8x128xf32>
      %124 = arith.mulf %76, %123 : vector<8x128xf32>
      %c2_72 = arith.constant 2 : index
      %125 = memref.load %arg3[%c2_72] : memref<3xf32, #tpu.memory_space<smem>>
      %126 = vector.broadcast %125 : f32 to vector<8x128xf32>
      %127 = arith.addf %124, %126 : vector<8x128xf32>
      %c2_73 = arith.constant 2 : index
      %c1_74 = arith.constant 1 : index
      %128 = memref.load %arg2[%c2_73, %c1_74] : memref<3x4xf32, #tpu.memory_space<smem>>
      %129 = vector.broadcast %128 : f32 to vector<8x128xf32>
      %130 = arith.mulf %79, %129 : vector<8x128xf32>
      %131 = arith.addf %127, %130 : vector<8x128xf32>
      %c2_75 = arith.constant 2 : index
      %c2_76 = arith.constant 2 : index
      %132 = memref.load %arg2[%c2_75, %c2_76] : memref<3x4xf32, #tpu.memory_space<smem>>
      %133 = vector.broadcast %132 : f32 to vector<8x128xf32>
      %134 = arith.mulf %82, %133 : vector<8x128xf32>
      %135 = arith.addf %131, %134 : vector<8x128xf32>
      %c2_77 = arith.constant 2 : index
      %c3_78 = arith.constant 3 : index
      %136 = memref.load %arg2[%c2_77, %c3_78] : memref<3x4xf32, #tpu.memory_space<smem>>
      %137 = vector.broadcast %136 : f32 to vector<8x128xf32>
      %138 = arith.mulf %85, %137 : vector<8x128xf32>
      %139 = arith.addf %135, %138 : vector<8x128xf32>
      %140 = arith.addi %0, %73 : i32
      %141 = vector.broadcast %140 : i32 to vector<8x128xi32>
      %142 = arith.addi %141, %1 : vector<8x128xi32>
      %c1_i32_79 = arith.constant 1 : i32
      %143 = vector.broadcast %c1_i32_79 : i32 to vector<8x128xi32>
      %144 = arith.cmpi sge, %142, %143 : vector<8x128xi32>
      %c16_i32_80 = arith.constant 16 : i32
      %145 = vector.broadcast %c16_i32_80 : i32 to vector<8x128xi32>
      %146 = arith.cmpi sle, %142, %145 : vector<8x128xi32>
      %147 = arith.andi %144, %146 : vector<8x128xi1>
      %148 = arith.andi %147, %7 : vector<8x128xi1>
      %c1_i32_81 = arith.constant 1 : i32
      %149 = tpu.dynamic_rotate %103 by %c1_i32_81 dim 0 : vector<8x128xf32>, i32 -> vector<8x128xf32>
      %c0_i32_82 = arith.constant 0 : i32
      %150 = vector.broadcast %c0_i32_82 : i32 to vector<8x128xi32>
      %151 = arith.cmpi eq, %1, %150 : vector<8x128xi32>
      %152 = vector.shape_cast %arg8 : vector<1x128xf32> to vector<1x128xf32>
      %153 = vector.broadcast %152 : vector<1x128xf32> to vector<8x128xf32>
      %154 = arith.select %151, %153, %149 : vector<8x128xi1>, vector<8x128xf32>
      %c1_i32_83 = arith.constant 1 : i32
      %155 = tpu.dynamic_rotate %154 by %c1_i32_83 dim 1 : vector<8x128xf32>, i32 -> vector<8x128xf32>
      %c0_84 = arith.constant 0 : index
      %156 = memref.load %arg3[%c0_84] : memref<3xf32, #tpu.memory_space<smem>>
      %157 = vector.broadcast %156 : f32 to vector<8x128xf32>
      %158 = arith.select %148, %155, %157 : vector<8x128xi1>, vector<8x128xf32>
      %159 = arith.negf %158 : vector<8x128xf32>
      %160 = math.exp %159 : vector<8x128xf32>
      %cst = arith.constant 1.000000e+00 : f32
      %161 = vector.broadcast %cst : f32 to vector<8x128xf32>
      %162 = arith.addf %161, %160 : vector<8x128xf32>
      %163 = arith.divf %161, %162 : vector<8x128xf32>
      %c0_85 = arith.constant 0 : index
      %c0_86 = arith.constant 0 : index
      %164 = arith.index_cast %73 : i32 to index
      %c0_87 = arith.constant 0 : index
      %165 = vector.load %arg6[%c0_85, %c0_86, %164, %c0_87] : memref<1x3x24x128xf32, #tpu.memory_space<vmem>>, vector<1x1x8x128xf32>
      %166 = vector.shape_cast %165 : vector<1x1x8x128xf32> to vector<8x128xf32>
      %167 = vector.shape_cast %163 : vector<8x128xf32> to vector<1x1x8x128xf32>
      tpu.vector_store %arg6[%c0_85, %c0_86, %164, %c0_87], %167 {strides = array<i32>} : memref<1x3x24x128xf32, #tpu.memory_space<vmem>>, vector<1x1x8x128xf32>,
      %168 = vector.extract_strided_slice %103 {offsets = [7, 0], sizes = [1, 128], strides = [1, 1]} : vector<8x128xf32> to vector<1x128xf32>
      %c1_i32_88 = arith.constant 1 : i32
      %169 = tpu.dynamic_rotate %121 by %c1_i32_88 dim 0 : vector<8x128xf32>, i32 -> vector<8x128xf32>
      %c0_i32_89 = arith.constant 0 : i32
      %170 = vector.broadcast %c0_i32_89 : i32 to vector<8x128xi32>
      %171 = arith.cmpi eq, %1, %170 : vector<8x128xi32>
      %172 = vector.shape_cast %arg9 : vector<1x128xf32> to vector<1x128xf32>
      %173 = vector.broadcast %172 : vector<1x128xf32> to vector<8x128xf32>
      %174 = arith.select %171, %173, %169 : vector<8x128xi1>, vector<8x128xf32>
      %c1_i32_90 = arith.constant 1 : i32
      %175 = tpu.dynamic_rotate %174 by %c1_i32_90 dim 1 : vector<8x128xf32>, i32 -> vector<8x128xf32>
      %c1_91 = arith.constant 1 : index
      %176 = memref.load %arg3[%c1_91] : memref<3xf32, #tpu.memory_space<smem>>
      %177 = vector.broadcast %176 : f32 to vector<8x128xf32>
      %178 = arith.select %148, %175, %177 : vector<8x128xi1>, vector<8x128xf32>
      %179 = arith.negf %178 : vector<8x128xf32>
      %180 = math.exp %179 : vector<8x128xf32>
      %cst_92 = arith.constant 1.000000e+00 : f32
      %181 = vector.broadcast %cst_92 : f32 to vector<8x128xf32>
      %182 = arith.addf %181, %180 : vector<8x128xf32>
      %183 = arith.divf %181, %182 : vector<8x128xf32>
      %c0_93 = arith.constant 0 : index
      %c1_94 = arith.constant 1 : index
      %184 = arith.index_cast %73 : i32 to index
      %c0_95 = arith.constant 0 : index
      %185 = vector.load %arg6[%c0_93, %c1_94, %184, %c0_95] : memref<1x3x24x128xf32, #tpu.memory_space<vmem>>, vector<1x1x8x128xf32>
      %186 = vector.shape_cast %185 : vector<1x1x8x128xf32> to vector<8x128xf32>
      %187 = vector.shape_cast %183 : vector<8x128xf32> to vector<1x1x8x128xf32>
      tpu.vector_store %arg6[%c0_93, %c1_94, %184, %c0_95], %187 {strides = array<i32>} : memref<1x3x24x128xf32, #tpu.memory_space<vmem>>, vector<1x1x8x128xf32>,
      %188 = vector.extract_strided_slice %121 {offsets = [7, 0], sizes = [1, 128], strides = [1, 1]} : vector<8x128xf32> to vector<1x128xf32>
      %c1_i32_96 = arith.constant 1 : i32
      %189 = tpu.dynamic_rotate %139 by %c1_i32_96 dim 0 : vector<8x128xf32>, i32 -> vector<8x128xf32>
      %c0_i32_97 = arith.constant 0 : i32
      %190 = vector.broadcast %c0_i32_97 : i32 to vector<8x128xi32>
      %191 = arith.cmpi eq, %1, %190 : vector<8x128xi32>
      %192 = vector.shape_cast %arg10 : vector<1x128xf32> to vector<1x128xf32>
      %193 = vector.broadcast %192 : vector<1x128xf32> to vector<8x128xf32>
      %194 = arith.select %191, %193, %189 : vector<8x128xi1>, vector<8x128xf32>
      %c1_i32_98 = arith.constant 1 : i32
      %195 = tpu.dynamic_rotate %194 by %c1_i32_98 dim 1 : vector<8x128xf32>, i32 -> vector<8x128xf32>
      %c2_99 = arith.constant 2 : index
      %196 = memref.load %arg3[%c2_99] : memref<3xf32, #tpu.memory_space<smem>>
      %197 = vector.broadcast %196 : f32 to vector<8x128xf32>
      %198 = arith.select %148, %195, %197 : vector<8x128xi1>, vector<8x128xf32>
      %199 = arith.negf %198 : vector<8x128xf32>
      %200 = math.exp %199 : vector<8x128xf32>
      %cst_100 = arith.constant 1.000000e+00 : f32
      %201 = vector.broadcast %cst_100 : f32 to vector<8x128xf32>
      %202 = arith.addf %201, %200 : vector<8x128xf32>
      %203 = arith.divf %201, %202 : vector<8x128xf32>
      %c0_101 = arith.constant 0 : index
      %c2_102 = arith.constant 2 : index
      %204 = arith.index_cast %73 : i32 to index
      %c0_103 = arith.constant 0 : index
      %205 = vector.load %arg6[%c0_101, %c2_102, %204, %c0_103] : memref<1x3x24x128xf32, #tpu.memory_space<vmem>>, vector<1x1x8x128xf32>
      %206 = vector.shape_cast %205 : vector<1x1x8x128xf32> to vector<8x128xf32>
      %207 = vector.shape_cast %203 : vector<8x128xf32> to vector<1x1x8x128xf32>
      tpu.vector_store %arg6[%c0_101, %c2_102, %204, %c0_103], %207 {strides = array<i32>} : memref<1x3x24x128xf32, #tpu.memory_space<vmem>>, vector<1x1x8x128xf32>,
      %208 = vector.extract_strided_slice %139 {offsets = [7, 0], sizes = [1, 128], strides = [1, 1]} : vector<8x128xf32> to vector<1x128xf32>
      scf.yield %168, %188, %208 : vector<1x128xf32>, vector<1x128xf32>, vector<1x128xf32>
    }
    %c3_i32_39 = arith.constant 3 : i32
    return
  }
  func.func @transform_0(%arg0: i32, %arg1: i32) -> (i32, i32) {
    %c0_i32 = arith.constant 0 : i32
    %c0_i32_0 = arith.constant 0 : i32
    %c0_i32_1 = arith.constant 0 : i32
    return %c0_i32, %c0_i32_0 : i32, i32
  }
  func.func @transform_1(%arg0: i32, %arg1: i32) -> i32 {
    %c0_i32 = arith.constant 0 : i32
    %c0_i32_0 = arith.constant 0 : i32
    return %c0_i32 : i32
  }
  func.func @transform_2(%arg0: i32, %arg1: i32) -> (i32, i32, i32, i32) {
    %c0_i32 = arith.constant 0 : i32
    %0 = arith.minsi %arg1, %c0_i32 : i32
    %c0_i32_0 = arith.constant 0 : i32
    %c0_i32_1 = arith.constant 0 : i32
    %c0_i32_2 = arith.constant 0 : i32
    return %arg0, %c0_i32_0, %0, %c0_i32_1 : i32, i32, i32, i32
  }
  func.func @transform_3(%arg0: i32, %arg1: i32) -> (i32, i32, i32, i32) {
    %c3_i32 = arith.constant 3 : i32
    %0 = arith.muli %arg1, %c3_i32 : i32
    %c1_i32 = arith.constant 1 : i32
    %1 = arith.subi %0, %c1_i32 : i32
    %c0_i32 = arith.constant 0 : i32
    %c1_i32_0 = arith.constant 1 : i32
    %2 = arith.maxsi %c0_i32, %1 : i32
    %3 = arith.minsi %c1_i32_0, %2 : i32
    %c0_i32_1 = arith.constant 0 : i32
    %c0_i32_2 = arith.constant 0 : i32
    %c0_i32_3 = arith.constant 0 : i32
    return %arg0, %c0_i32_1, %3, %c0_i32_2 : i32, i32, i32, i32
  }
  func.func @transform_4(%arg0: i32, %arg1: i32) -> (i32, i32, i32, i32) {
    %c0_i32 = arith.constant 0 : i32
    %c0_i32_0 = arith.constant 0 : i32
    %c0_i32_1 = arith.constant 0 : i32
    return %arg0, %c0_i32, %arg1, %c0_i32_0 : i32, i32, i32, i32
  }
}

</mosaic_0001>

<bundles_post_ra>
// kernel: tpu_custom_call.1
= control target key start
LH: loop header
LB: loop body
LE: loop exit
PB: predicated region body
PF: predicated region fallthrough
CT: control target
= control target key end

     0   :  { %s1372_s0 = inlined_call_operand.hbm [shape: f32[3,4], index: 0, kind: input, shape index: {}]   ;;  %s1373_s1 = inlined_call_operand.vmem [shape: f32[3], index: 1, kind: input, shape index: {}]   ;;  %s1374_s2 = inlined_call_operand.hbm [shape: f32[2,4,16,16], index: 2, kind: input, shape index: {}]   ;;  %s1375_s3 = inlined_call_operand.hbm [shape: f32[2,4,16,16], index: 3, kind: input, shape index: {}]   ;;  %s1376_s4 = inlined_call_operand.vmem [shape: f32[2,3,18,18], index: 4, kind: output, shape index: {}]  }
   0x1   :  { %1377 = sst [smem:[#allocation16_spill]] %s1372_s0 }
   0x2   :  { %9 = vsyncpa [#allocation4], 0 }
   0x3   :  { %10 = vsyncpa [#allocation5], 0 }
   0x4   :  { %11 = vsyncpa [#allocation3], 0 }
   0x5   :  { %13 = vsyncpa [#allocation3 + $0x1], 0 }
   0x6   :  { %14 = vsyncpa [#allocation9], 0 }
   0x7   :  { %16 = vsyncpa [#allocation9 + $0x1], 0  ;;  %s1153_s15 = smov 0   ;;  %s1155_s16 = smov 0  }
   0x8   :  { %s1157_s17 = smov 0   ;;  %s1159_s18 = smov 0  }
   0x9   :  { %s1161_s19 = smov 0   ;;  %s1163_s20 = smov 0  }
   0xa LB: > { %s771_s21 = sadd.s32 4294967295, %s1097_s20   ;;  %s34_s22 = sadd.s32 1, %s1093_s19  ;;  %s1097_s20 = sphi %s1163_s20, %s22_s20   ;;  %s1093_s19 = sphi %s1161_s19, %s1390_s19   ;;  %s1089_s18 = sphi %s1159_s18, %s1389_s18   ;;  %s1085_s17 = sphi %s1157_s17, %s1388_s17   ;;  %s1081_s16 = sphi %s1155_s16, %s1387_s16   ;;  %s1077_s15 = sphi %s1153_s15, %s1386_s15  }
   0xb   : > { %p36_p0 = scmp.ge.s32.totalorder %s34_s22, 2  ;;  %s89_s23 = sadd.s32 1, %s1085_s17 }
   0xc   : > { %p96_p1 = scmp.ne.s32.totalorder %s1085_s17, %s1081_s16  ;;  %p97_p2 = scmp.eq.s32.totalorder %s1097_s20, 0 }
   0xd   : > { %s1392_s22 = smov (%p36_p0, %s34_s22), 0  ;;  %p102_p4 = scmp.ne.s32.totalorder %s1081_s16, %s1077_s15 }
   0xe   : > { %p1189_p3 = por %p97_p2, %p96_p1  ;;  %s84_s25 = ssub.s32 %s1093_s19, %s1392_s22 }
   0xf   : > { %p1196_p5 = scmp.eq.s32.totalorder %s771_s21, 0  ;;  %p87_p6 = scmp.eq.s32.totalorder %s84_s25, 0 }
  0x10   : > { %p773_p7 = scmp.ge.s32.totalorder %s1097_s20, 1  ;;  %p181_p9 = scmp.lt.s32.totalorder %s1097_s20, 3 }
  0x11   : > { %p1203_p8 = por %p1196_p5, %p102_p4  ;;  %s203_s6 = sshll.u32 %s1373_s1, 4  ;;  %s204_s6 = int_to_ptr.vmem [resolvable:$true] %s203_s6 }
  0x12   : > { %s1209_s28 = scalar_select %p87_p6, %s1085_s17, %s89_s23  }
  0x13   : > { %p1211_p10 = pnand %p773_p7, %p181_p9  ;;  %s1115_s8 = smov [#allocation2]  }
  0x14   : > { %s1383_s0 = sld [smem:[#allocation16_spill]]  ;;  %s978_s11 = scalar_lea.vmem %s204_s6, 16 }
  0x15   : > { %p852_p11 = pneg %p1211_p10  ;;  %p979_p13 = scmp.ne.s32.totalorder %s204_s6, %s978_s11 }
  0x16   : > { %p986_p4 = scmp.lt.s32.totalorder %s204_s6, %s204_s6  ;;  %p987_p6 = scmp.lt.s32.totalorder %s978_s11, %s978_s11 }
  0x17   : > { %p1222_p12 = pnand %p852_p11, %p1196_p5 }
  0x18   : > { %p988_p7 = por %p987_p6, %p986_p4 }
  0x19   : > { %p980_p0 = pneg %p1222_p12 }
  0x1a   : > { %855 = dma.hbm_to_smem (!%p1222_p12), %s1383_s0, 64, %s1115_s8, [#allocation4]  }
  0x1b   : > { %p981_p1 = pnand %p980_p0, %p979_p13 }
  0x1d   : > { %p982_p2 = pneg %p981_p1 }
  0x1f   : > { %p989_p9 = pnand %p988_p7, %p982_p2 }
  0x21   : > { %992 = shalt.err (!%p989_p9)
}
  0x22   : > { %s1116_s12 = smov [#allocation6]   ;;  %p776_p11 = scmp.ge.s32.totalorder %s1097_s20, 2 }
  0x23   : > { %858 = dma.vmem_to_smem (!%p1222_p12), %s204_s6, 16, %s1116_s12, [#allocation5]  }
  0x24   : > { %210 = sbr.rel (%p776_p11) target bundleno = 77 (0x4d), region = 24 }
  0x29   : > { %213 = sbr.rel (!%p1189_p3) target bundleno = 60 (0x3c), region = 28 }
  0x2e   : > { %s214_s13 = sand.u32 1, %s1085_s17  }
  0x2f   : > { %s838_s14 = smul.u32 96, %s214_s13  ;;  %s215_s15 = scalar_lea.sflag [#allocation3], %s214_s13 }
  0x31   : > { %s218_s21 = scalar_lea.vmem [#allocation7], %s838_s14 }
  0x32   : > { %226 = vsyncadd %s215_s15, 512  ;;  %s836_s23 = sshll.u32 %s1093_s19, 10  ;;  %s238_s25 = sld [smem:[#allocation0]]  }
  0x33   : > { %s231_s7 = scalar_lea.hbm %s1374_s2, %s836_s23  ;;  %s246_s6 = sshll.u32 %s218_s21, 4  ;;  %s247_s6 = int_to_ptr.vmem [resolvable:$true] %s246_s6 }
  0x34   : > { %s1117_s8 = smov 256   ;;  %s1118_s9 = smov 384  }
  0x35   : > { %253 = sst [smem:[#allocation11]] %s1117_s8  ;;  %s1119_s10 = smov 2  }
  0x36   : > { %255 = sst [smem:[#allocation11 + $0x1]] %s1118_s9  ;;  %s1120_s12 = smov 128  }
  0x37   : > { %257 = sst [smem:[#allocation11 + $0x2]] %s1119_s10  ;;  %s1121_s14 = smov 8  }
  0x38   : > { %s779_s11 = sshll.u32 %s238_s25, 26  ;;  %259 = sst [smem:[#allocation11 + $0x3]] %s1120_s12 }
  0x39   : > { %s780_s13 = sadd.s32 134217728, %s779_s11  ;;  %261 = sst [smem:[#allocation11 + $0x4]] %s1120_s12 }
  0x3a   : > { %263 = sst [smem:[#allocation11 + $0x5]] %s1121_s14  ;;  %s1122_s0 = smov 131072  }
  0x3b   : > { %265 = dma.general %s231_s7, 1024, %s247_s6, %s215_s15, %s1122_s0, [#allocation11], %s780_s13, 0  }
  0x3c PF: > { %s269_s21 = sand.u32 1, %s1085_s17   ;;  %s837_s23 = sshll.u32 %s1093_s19, 10 }
  0x3d   : > { %s781_s30 = sshll.u32 %s269_s21, 5  ;;  %s286_s9 = scalar_lea.hbm %s1375_s3, %s837_s23 }
  0x3e   : > { %s273_s25 = scalar_lea.vmem [#allocation8], %s781_s30  ;;  %s270_s11 = scalar_lea.sflag [#allocation9], %s269_s21 }
  0x3f   : > { %s287_s10 = sshll.u32 %s273_s25, 4  ;;  %s1123_s0 = smov [#allocation8]   ;;  %s288_s10 = int_to_ptr.vmem [resolvable:$true] %s287_s10 }
  0x40   : > { %s1005_s12 = scalar_lea.vmem %s288_s10, 512  ;;  %s1009_s15 = sshll.u32 %s1123_s0, 4  ;;  %s1010_s15 = int_to_ptr.vmem [resolvable:$false] %s1009_s15 }
  0x41   : > { %p1006_p12 = scmp.ne.s32.totalorder %s288_s10, %s1005_s12  ;;  %s1011_s7 = scalar_lea.vmem %s1010_s15, 1024 }
  0x42   : > { %p1012_p1 = scmp.lt.s32.totalorder %s288_s10, %s1010_s15  ;;  %p1013_p2 = scmp.lt.s32.totalorder %s1011_s7, %s1005_s12 }
  0x43   : > { %p1007_p13 = pnand %p1006_p12, %p1189_p3 }
  0x44   : > { %p1014_p4 = por %p1013_p2, %p1012_p1 }
  0x45   : > { %p1008_p0 = pneg %p1007_p13 }
  0x47   : > { %p1015_p6 = pnand %p1014_p4, %p1008_p0 }
  0x49   : > { %1018 = shalt.err (!%p1015_p6)
}
  0x4a   : > { %s1124_s6 = smov 256   ;;  %s1125_s13 = smov 128  }
  0x4b   : > { %s1126_s14 = smov 8  }
  0x4c   : > { %845 = dma.hbm_to_vmem [thread:$0]  (%p1189_p3), %s286_s9, 512, %s288_s10, %s270_s11, %s1124_s6, %s1125_s13, %s1126_s14  }
  0x4d PF: > { %299 = sbr.rel (%p1211_p10) target bundleno = 300 (0x12c), region = 36 }
  0x52   : > { %1060 = dma.done.wait (%p1196_p5), [#allocation4], 64  }
  0x53   : > { %1062 = vsyncadd (%p1196_p5), [#allocation4], 4294967232 }
  0x54   : > { %1064 = dma.done.wait (%p1196_p5), [#allocation5], 16  }
  0x55   : > { %1066 = vsyncadd (%p1196_p5), [#allocation5], 4294967280  ;;  %s309_s24 = sand.u32 1, %s1081_s16  }
  0x56   : > { %s839_s21 = smul.u32 96, %s309_s24  ;;  %s310_s23 = scalar_lea.sflag [#allocation3], %s309_s24 }
  0x58   : > { %s1263_s30 = scalar_lea.vmem [#allocation7], %s839_s21 }
  0x59   : > { %1068 = dma.done.wait (%p1203_p8), %s310_s23, 1536  }
  0x5a   : > { %1070 = vsyncadd (%p1203_p8), %s310_s23, 4294965760  ;;  %s787_s29 = sshll.u32 %s309_s24, 5  ;;  %s319_s5 = scalar_lea.sflag [#allocation9], %s309_s24 }
  0x5b   : > { %s322_s8 = scalar_lea.vmem [#allocation8], %s787_s29 }
  0x5c   : > { %1072 = dma.done.wait (%p1203_p8), %s319_s5, 512  }
  0x5d   : > { %1074 = vsyncadd (%p1203_p8), %s319_s5, 4294966784 }
  0x5e   : > { %327 = sfence }
  0x5f   : > { %p369_p3 = scmp.lt.s32.totalorder %s1089_s18, 1  ;;  %v379_v0 = vlaneseq  ;;  %s393_s26 = sld [smem:[#allocation2]]  ;;  %v386_v4 = vld [vmem:[%s322_s8 + $0x7] sm:$0x1]  ;;  %v789_v6 = vld [vmem:[%s322_s8 + $0xf] sm:$0x1] }
  0x60   : > { %s396_s9 = sld [smem:[#allocation6]]  ;;  %v790_v8 = vld [vmem:[%s322_s8 + $0x17] sm:$0x1]  ;;  %v791_v10 = vld [vmem:[%s322_s8 + $0x1f] sm:$0x1]  ;;  %s1292_s8 = smov 0  }
  0x61   : > { %s1394_s18 = smov (!%p369_p3, %s1089_s18), 1  ;;  %v1275_v1 = vshrl.u32 %v379_v0, 7  ;;  %v382_v2 = vand.u32 127, %v379_v0  ;;  %s792_s10 = sld [smem:[#allocation2 + $0x1]] }
  0x62   : > { %s840_s25 = smul.u32 72, %s1394_s18  ;;  %s793_s27 = sld [smem:[#allocation2 + $0x2]] }
  0x63   : > { %vm383_vm0 = vcmp.ge.s32.totalorder %v382_v2, 1  ;;  %vm384_vm1 = vcmp.le.s32.totalorder %v382_v2, 16  ;;  %s794_s15 = sld [smem:[#allocation2 + $0x3]] }
  0x64   : > { %vm1277_vm2 = vmand %vm383_vm0, %vm384_vm1  ;;  %s1284_s0 = scalar_lea.vmem %s1376_s4, %s840_s25  ;;  %s795_s7 = sld [smem:[#allocation2 + $0x80]] }
  0x65   : > { %v394_v5 = vstv %s393_s26  ;;  %s796_s18 = sld [smem:[#allocation6 + $0x1]] }
  0x66   : > { %v395_v7 = vmul.f32 %v394_v5, %v386_v4  ;;  %v397_v9 = vstv %s396_s9  ;;  %s797_s6 = sld [smem:[#allocation2 + $0x81]] }
  0x67   : > { %v400_v12 = vstv %s792_s10  ;;  %s798_s13 = sld [smem:[#allocation2 + $0x82]] }
  0x68   : > { %v398_v11 = vadd.f32 %v397_v9, %v395_v7  ;;  %v401_v13 = vmul.f32 %v789_v6, %v400_v12  ;;  %v404_v14 = vstv %s793_s27  ;;  %s799_s14 = sld [smem:[#allocation2 + $0x83]] }
  0x69   : > { %v405_v15 = vmul.f32 %v790_v8, %v404_v14  ;;  %v408_v16 = vstv %s794_s15  ;;  %s800_s24 = sld [smem:[#allocation2 + $0x100]] }
  0x6a   : > { %v402_v17 = vadd.f32 %v401_v13, %v398_v11  ;;  %v409_v18 = vmul.f32 %v791_v10, %v408_v16  ;;  %v412_v19 = vstv %s795_s7  ;;  %s801_s21 = sld [smem:[#allocation6 + $0x2]] }
  0x6b   : > { %v413_v20 = vmul.f32 %v412_v19, %v386_v4  ;;  %v415_v21 = vstv %s796_s18  ;;  %s802_s23 = sld [smem:[#allocation2 + $0x101]] }
  0x6c   : > { %v406_v22 = vadd.f32 %v405_v15, %v402_v17  ;;  %v418_v23 = vstv %s797_s6  ;;  %s803_s29 = sld [smem:[#allocation2 + $0x102]] }
  0x6d   : > { %v416_v24 = vadd.f32 %v415_v21, %v413_v20  ;;  %v419_v25 = vmul.f32 %v789_v6, %v418_v23  ;;  %v422_v26 = vstv %s798_s13  ;;  %s804_s5 = sld [smem:[#allocation2 + $0x103]] }
  0x6e   : > { %v410_v27 = vadd.f32 %v409_v18, %v406_v22   ;;  %v423_v28 = vmul.f32 %v790_v8, %v422_v26  ;;  %v426_v29 = vstv %s799_s14 }
  0x6f   : > { %v420_v30 = vadd.f32 %v419_v25, %v416_v24  ;;  %v427_v31 = vmul.f32 %v791_v10, %v426_v29  ;;  %v430_v32 = vstv %s800_s24 }
  0x70   : > { %v431_v33 = vmul.f32 %v430_v32, %v386_v4  ;;  %v433_v34 = vstv %s801_s21 }
  0x71   : > { %v424_v35 = vadd.f32 %v423_v28, %v420_v30  ;;  %v436_v36 = vstv %s802_s23 }
  0x72   : > { %v434_v37 = vadd.f32 %v433_v34, %v431_v33  ;;  %v437_v38 = vmul.f32 %v789_v6, %v436_v36  ;;  %v440_v39 = vstv %s803_s29 }
  0x73   : > { %v428_v40 = vadd.f32 %v427_v31, %v424_v35   ;;  %v441_v41 = vmul.f32 %v790_v8, %v440_v39  ;;  %v444_v42 = vstv %s804_s5 }
  0x74   : > { %v438_v43 = vadd.f32 %v437_v38, %v434_v37  ;;  %v445_v44 = vmul.f32 %v791_v10, %v444_v42 }
  0x76   : > { %v442_v45 = vadd.f32 %v441_v41, %v438_v43 }
  0x78   : > { %v446_v46 = vadd.f32 %v445_v44, %v442_v45  }
  0x79 LB: >> { %s468_s26 = sld [smem:[#allocation2]]  ;;  %s1307_s25 = sshll.u32 %s1113_s8, 3  ;;  %v533_v62 = vsub.s32 0, %v1275_v1  ;;  %vm530_vm3 = vcmp.eq.s32.totalorder %v1275_v1, 0  ;;  %s1113_s8 = sphi %s1292_s8, %s452_s8   ;;  %v1109_v27 = vphi %v410_v27, %v529_v27   ;;  %v1105_v40 = vphi %v428_v40, %v547_v40   ;;  %v1101_v46 = vphi %v446_v46, %v566_v46  }
  0x7a   : >> { %s1304_s9 = sld [smem:[#allocation6]]  ;;  %s457_s27 = scalar_lea.vmem %s1263_s30, %s1307_s25 [#allocation7]  ;;  %v523_v36 = vstv %s1307_s25 }
  0x7b   : >> { %s812_s10 = sld [smem:[#allocation2 + $0x1]]  ;;  %v458_v47 = vld [vmem:[%s457_s27] sm:$0xff]  ;;  %v807_v48 = vld [vmem:[%s457_s27 + $0x18] sm:$0xff]  ;;  %v809_v50 = vld [vmem:[%s457_s27 + $0x30] sm:$0xff]  ;;  %v534_v10 = vrot.slane %v1109_v27, %v533_v62  ;;  %s1127_s5 = smov 1   ;;  %v551_v25 = vrot.slane %v1105_v40, %v533_v62  ;;  %v570_v34 = vrot.slane %v1101_v46, %v533_v62  ;;  %v524_v37 = vadd.s32 %v523_v36, %v1275_v1 }
  0x7c   : >> { %s813_s11 = sld [smem:[#allocation2 + $0x2]]  ;;  %v811_v53 = vld [vmem:[%s457_s27 + $0x48] sm:$0xff]  ;;  %s452_s8 = sadd.s32 1, %s1113_s8  }
  0x7d   : >> { %s814_s12 = sld [smem:[#allocation2 + $0x3]]  ;;  %vm525_vm4 = vcmp.ge.s32.totalorder %v524_v37, 1  ;;  %vm526_vm5 = vcmp.le.s32.totalorder %v524_v37, 16  ;;  %p449_p5 = scmp.ge.s32.totalorder %s452_s8, 3  }
  0x7e   : >> { %s815_s15 = sld [smem:[#allocation2 + $0x80]]  ;;  %vm527_vm6 = vmand %vm525_vm4, %vm526_vm5 }
  0x7f   : >> { %v469_v49 = vstv %s468_s26  ;;  %s1311_s7 = sld [smem:[#allocation6 + $0x1]]  ;;  %vm528_vm7 = vmand %vm527_vm6, %vm1277_vm2  ;;  %s545_s26 = scalar_lea.vmem %s1284_s0, %s1307_s25 }
  0x80   : >> { %v470_v51 = vmul.f32 %v469_v49, %v458_v47  ;;  %v472_v52 = vstv %s1304_s9  ;;  %s817_s18 = sld [smem:[#allocation2 + $0x81]] }
  0x81   : >> { %v475_v54 = vstv %s812_s10  ;;  %s818_s6 = sld [smem:[#allocation2 + $0x82]] }
  0x82   : >> { %v473_v55 = vadd.f32 %v472_v52, %v470_v51  ;;  %v476_v56 = vmul.f32 %v807_v48, %v475_v54  ;;  %v479_v57 = vstv %s813_s11  ;;  %s819_s13 = sld [smem:[#allocation2 + $0x83]] }
  0x83   : >> { %v480_v58 = vmul.f32 %v809_v50, %v479_v57  ;;  %v483_v59 = vstv %s814_s12  ;;  %s820_s14 = sld [smem:[#allocation2 + $0x100]] }
  0x84   : >> { %v477_v60 = vadd.f32 %v476_v56, %v473_v55  ;;  %v484_v61 = vmul.f32 %v811_v53, %v483_v59  ;;  %v487_v63 = vstv %s815_s15  ;;  %s1317_s24 = sld [smem:[#allocation6 + $0x2]] }
  0x85   : >> { %v488_v0 = vmul.f32 %v487_v63, %v458_v47  ;;  %v490_v2 = vstv %s1311_s7  ;;  %s822_s21 = sld [smem:[#allocation2 + $0x101]] }
  0x86   : >> { %v481_v4 = vadd.f32 %v480_v58, %v477_v60  ;;  %v493_v5 = vstv %s817_s18  ;;  %s823_s23 = sld [smem:[#allocation2 + $0x102]] }
  0x87   : >> { %v491_v6 = vadd.f32 %v490_v2, %v488_v0  ;;  %v494_v7 = vmul.f32 %v807_v48, %v493_v5  ;;  %v497_v8 = vstv %s818_s6  ;;  %s824_s29 = sld [smem:[#allocation2 + $0x103]] }
  0x88   : >> { %v1320_v9 = vadd.f32 %v484_v61, %v481_v4  ;;  %v498_v11 = vmul.f32 %v809_v50, %v497_v8  ;;  %v501_v12 = vstv %s819_s13 }
  0x89   : >> { %v495_v13 = vadd.f32 %v494_v7, %v491_v6  ;;  %v502_v14 = vmul.f32 %v811_v53, %v501_v12  ;;  %v505_v15 = vstv %s820_s14 }
  0x8a   : >> { %v529_v27 = vrot.slane %v1320_v9, 7   ;;  %v506_v16 = vmul.f32 %v505_v15, %v458_v47  ;;  %v508_v17 = vstv %s1317_s24 }
  0x8b   : >> { %v499_v18 = vadd.f32 %v498_v11, %v495_v13  ;;  %v511_v19 = vstv %s822_s21 }
  0x8c   : >> { %v535_v20 = vsel %vm530_vm3, %v534_v10, %v529_v27  ;;  %v509_v21 = vadd.f32 %v508_v17, %v506_v16  ;;  %v512_v22 = vmul.f32 %v807_v48, %v511_v19  ;;  %v515_v23 = vstv %s823_s23 }
  0x8d   : >> { %536 = vrot.lane.b32.xlu0 %v535_v20, %s1127_s5  ;;  %v503_v24 = vadd.f32 %v502_v14, %v499_v18  ;;  %v516_v26 = vmul.f32 %v809_v50, %v515_v23  ;;  %v519_v28 = vstv %s824_s29 }
  0x8e   : >> { %v513_v29 = vadd.f32 %v512_v22, %v509_v21  ;;  %v520_v30 = vmul.f32 %v811_v53, %v519_v28 }
  0x8f   : >> { %v547_v40 = vrot.slane %v503_v24, 7  }
  0x90   : >> { %v517_v31 = vadd.f32 %v516_v26, %v513_v29 }
  0x91   : >> { %v552_v32 = vsel %vm530_vm3, %v551_v25, %v547_v40 }
  0x92   : >> { %553 = vrot.lane.b32.xlu0 %v552_v32, %s1127_s5  ;;  %v521_v33 = vadd.f32 %v520_v30, %v517_v31 }
  0x94   : >> { %v566_v46 = vrot.slane %v521_v33, 7  }
  0x96   : >> { %v571_v35 = vsel %vm530_vm3, %v570_v34, %v566_v46 }
  0x97   : >> { %572 = vrot.lane.b32.xlu1 %v571_v35, %s1127_s5 }
  0xff   : >> { %v537_v38 = vpop.permute.xlu0 %536 }
 0x100   : >> { %v538_v39 = vsel %vm528_vm7, %v537_v38, %v472_v52 }
 0x101   : >> { %v825_v41 = vmul.f32 -1.442695, %v538_v39 }
 0x103   : >> { %955 = vpow2.f32 %v825_v41 }
 0x104   : >> { %v554_v42 = vpop.permute.xlu0 %553 }
 0x105   : >> { %v557_v43 = vsel %vm528_vm7, %v554_v42, %v490_v2 }
 0x106   : >> { %v827_v44 = vmul.f32 -1.442695, %v557_v43 }
 0x108   : >> { %957 = vpow2.f32 %v827_v44 }
 0x109   : >> { %v573_v45 = vpop.permute.xlu1 %572 }
 0x10a   : >> { %v576_v47 = vsel %vm528_vm7, %v573_v45, %v508_v17 }
 0x10b   : >> { %v831_v48 = vmul.f32 -1.442695, %v576_v47 }
 0x10d   : >> { %959 = vpow2.f32 %v831_v48 }
 0x110   : >> { %v956_v49 = vpop.eup %955 }
 0x111   : >> { %v542_v50 = vadd.f32 1.0, %v956_v49 }
 0x113   : >> { %961 = vrcp.f32 %v542_v50 }
 0x115   : >> { %v958_v51 = vpop.eup %957 }
 0x116   : >> { %v561_v53 = vadd.f32 1.0, %v958_v51 }
 0x118   : >> { %963 = vrcp.f32 %v561_v53 }
 0x11a   : >> { %v960_v54 = vpop.eup %959 }
 0x11b   : >> { %v580_v52 = vadd.f32 1.0, %v960_v54 }
 0x11d   : >> { %965 = vrcp.f32 %v580_v52 }
 0x120   : >> { %v962_v55 = vpop.eup %961 }
 0x121   : >> { %546 = vst [vmem:[%s545_s26] sm:$0xff] %v962_v55 }
 0x125   : >> { %v964_v56 = vpop.eup %963 }
 0x126   : >> { %829 = vst [vmem:[%s545_s26 + $0x18] sm:$0xff] %v964_v56 }
 0x127   : > { %451 = sbr.rel (!%p449_p5) target bundleno = 121 (0x79), region = 121 }
 0x12a   : >> { %v966_v57 = vpop.eup %965 }
 0x12b   : >> { %833 = vst [vmem:[%s545_s26 + $0x30] sm:$0xff] %v966_v57 }
 0x12c PF: > { %s22_s20 = sadd.s32 1, %s1097_s20   ;;  %s1386_s15 = smov %s1081_s16 }
 0x12d   : > { %p19_p8 = scmp.ge.s32.totalorder %s22_s20, 4   ;;  %s1387_s16 = smov %s1085_s17 }
 0x12e   : > { %s1388_s17 = smov %s1209_s28  ;;  %s1389_s18 = smov %s1093_s19 }
 0x12f   : > { %s1390_s19 = smov %s1392_s22  ;;  %21 = sbr.rel (!%p19_p8) target bundleno = 10 (0xa), region = 132 }
 0x134   :  { %624 = vsyncpa [#allocation3], 1 }
 0x135   :  { %626 = vsyncpa [#allocation3 + $0x1], 1 }
 0x136   :  { %627 = vsyncpa [#allocation9], 1 }
 0x137   :  { %629 = vsyncpa [#allocation9 + $0x1], 1 }
 0x138   :  { %630 = vsyncpa [#allocation4], 1 }
 0x139   :  { %632 = vsyncpa [#allocation4 + $0x1], 1 }
 0x13a   :  { %633 = vsyncpa [#allocation5], 1 }
 0x13b   :  { %635 = vsyncpa [#allocation5 + $0x1], 1 }

</bundles_post_ra>
